<compile_context>
chip_gen: v7x
topology: tpu7x:2x2x1
jax: 0.10.0
libtpu: 0.0.40
codegen_flags: <defaults>
</compile_context>

<pallas_src>
import functools

import jax
import jax.numpy as jnp
from jax import lax
from jax.experimental import pallas as pl
from jax.experimental.pallas import tpu as pltpu


_MiB = 1024 * 1024
_MAX_TILE_B = 1024        # rows; >=512 keeps layered weight streaming MXU-bound on v6e/v7x
_UNROLL_MAX_LAYERS = 4    # static unroll for small L, lax.fori_loop above this


@functools.lru_cache(maxsize=1)
def _vmem_capacity_bytes():
    """Per-TensorCore VMEM capacity (generation-aware, with safe fallbacks)."""
    try:
        cap = int(pltpu.get_tpu_info().vmem_capacity_bytes)
        if cap > 0:
            return cap
    except Exception:
        pass
    try:
        kind = jax.devices()[0].device_kind.lower()
        if "v7" in kind or "7x" in kind:
            return 64 * _MiB           # v7x: 64 MiB per TensorCore
        return 128 * _MiB              # v5e / v6e: 128 MiB
    except Exception:
        return 64 * _MiB               # conservative default


def _mm_bias(a, w_t, b_f32):
    """(a @ w_t) + b: matmul inputs in the weight dtype (bf16), f32 accumulation."""
    return jnp.dot(a.astype(w_t.dtype), w_t,
                   preferred_element_type=jnp.float32) + b_f32


def _resident_kernel(x_ref, wr_ref, br_ref, w1_ref, b1_ref, w2_ref, b2_ref,
                     o_ref, *, nlayers):
    # x_ref: (tb, H); wr_ref: (H, H) pre-transposed; w1/w2: (L, H, H); biases f32.
    x = x_ref[...].astype(jnp.float32)
    residual = _mm_bias(x, wr_ref[...], br_ref[...])

    def layer(l, out):
        h = _mm_bias(out, w1_ref[l], b1_ref[l])
        h = h * jax.nn.sigmoid(h)          # SiLU in f32 (EUP sigmoid slot)
        return _mm_bias(h, w2_ref[l], b2_ref[l])
        # Dropout(p) in eval mode == identity.

    if nlayers <= _UNROLL_MAX_LAYERS:
        out = x
        for l in range(nlayers):           # static unroll; weights resident in VMEM
            out = layer(l, out)
    else:
        # Large L: fori_loop keeps per-layer live ranges tight (no schedule bloat).
        out = lax.fori_loop(0, nlayers, layer, x)

    o_ref[...] = (out + residual).astype(o_ref.dtype)


def _layered_kernel(x_ref, wr_ref, br_ref, w1_ref, b1_ref, w2_ref, b2_ref,
                    o_ref, carry_ref, resid_ref):
    # grid = (B // tb, nlayers); one layer's (w1, w2) resident per step along l.
    # NOTE: correctness relies on the l axis being "arbitrary" (sequential) and the
    # output block being revisited across it (written only at l == L-1).
    l = pl.program_id(1)

    @pl.when(l == 0)
    def _init():
        x = x_ref[...].astype(jnp.float32)
        resid_ref[...] = _mm_bias(x, wr_ref[...], br_ref[...])
        carry_ref[...] = x.astype(carry_ref.dtype)

    h = _mm_bias(carry_ref[...], w1_ref[...], b1_ref[...])
    h = h * jax.nn.sigmoid(h)              # SiLU in f32
    carry_ref[...] = _mm_bias(h, w2_ref[...], b2_ref[...]).astype(carry_ref.dtype)
    # Dropout(p) in eval mode == identity.

    @pl.when(l == pl.num_programs(1) - 1)
    def _finish():
        o_ref[...] = (carry_ref[...].astype(jnp.float32)
                      + resid_ref[...]).astype(o_ref.dtype)


def prepare_params(params, *, weight_dtype=jnp.bfloat16):
    """One-time (amortized) conversion of PyTorch-convention Linear params:
    transpose so the kernel computes x @ W_t, cast weights (bf16 by default; pass
    weight_dtype=jnp.float32 for an accuracy-first path), keep biases in f32."""
    L, H, _ = params["w1"].shape
    return {
        "wr_t": params["wr"].T.astype(weight_dtype),                      # (H, H)
        "br": params["br"].reshape(1, H).astype(jnp.float32),             # (1, H)
        "w1_t": jnp.transpose(params["w1"], (0, 2, 1)).astype(weight_dtype),
        "b1": params["b1"].reshape(L, 1, H).astype(jnp.float32),
        "w2_t": jnp.transpose(params["w2"], (0, 2, 1)).astype(weight_dtype),
        "b2": params["b2"].reshape(L, 1, H).astype(jnp.float32),
    }


def _vmem_need(mode, tb, H, L, wbytes, inv_bufs=1):
    """Approximate VMEM footprint (bytes); inv_bufs = buffers on invariant blocks."""
    act = 2 * (2 * tb * H * 4)                                # x + out blocks, 2 buffers
    if mode == "resident":
        w = inv_bufs * (2 * L + 1) * H * H * wbytes           # all weights
        b = inv_bufs * (2 * L + 1) * H * 4                    # all biases
        scratch = 0
    else:  # layered
        w = inv_bufs * H * H * wbytes + 2 * 2 * H * H * wbytes    # wr + (w1,w2)[l] dbl-buf
        b = inv_bufs * H * 4 + 2 * 2 * H * 4
        scratch = tb * H * (wbytes + 4)                       # carry (weight dtype) + f32 residual
    return act + w + b + scratch


def _vmem_limit(need):
    # Leave headroom for Mosaic internal scratch / semaphores (matters on v7x's 64 MiB).
    ceiling = _vmem_capacity_bytes() - 8 * _MiB
    return int(min(max(need + 4 * _MiB, 16 * _MiB), ceiling))


def _choose_tile_b(B, H, L, wbytes, mode, budget):
    """Largest batch tile (multiple of 8 dividing B, capped at _MAX_TILE_B) whose
    footprint under `mode` fits `budget`.  Small batches stay one full block:
    filling the MXU M dim beats splitting into tiny tiles."""
    if B % 8 != 0:
        return B
    cands = [tb for tb in range(min(B, _MAX_TILE_B), 7, -8) if B % tb == 0]
    if not cands:
        return B
    fitting = [tb for tb in cands if _vmem_need(mode, tb, H, L, wbytes) <= budget]
    if not fitting:
        return cands[-1]
    best = fitting[0]
    # On 2-TensorCore parts (v7x signature: 64 MiB/TC) prefer >=2 grid steps so both
    # cores get work -- but only if the tiles stay >= 256 rows.
    if _vmem_capacity_bytes() <= 64 * _MiB and B // best < 2:
        for tb in fitting:
            if tb >= 256 and B // tb >= 2:
                return tb
    return best


def _plan(B, H, L, wbytes, tile_b, mode):
    budget = int(_vmem_capacity_bytes() * 0.8)   # ~102 MiB on v5e/v6e, ~51 MiB on v7x
    if mode in ("auto", "resident"):
        tb = tile_b if tile_b is not None else _choose_tile_b(
            B, H, L, wbytes, "resident", budget)
        if mode == "resident" or _vmem_need("resident", tb, H, L, wbytes) <= budget:
            return "resident", tb
    tb = tile_b if tile_b is not None else _choose_tile_b(
        B, H, L, wbytes, "layered", budget)
    return "layered", tb


def resnet_dense_block(x, prepared, *, tile_b=None, mode="auto"):
    """x: (B, H) float32. prepared: output of prepare_params()."""
    assert mode in ("auto", "resident", "layered")
    B, H = x.shape
    L = prepared["w1_t"].shape[0]
    assert prepared["w1_t"].shape[1:] == (H, H)
    wdtype = prepared["w1_t"].dtype
    wbytes = wdtype.itemsize

    mode, tb = _plan(B, H, L, wbytes, tile_b, mode)
    assert B % tb == 0, "tile_b must divide batch"
    assert tb % 8 == 0 or tb == B, "tile_b must be a multiple of 8 or equal B"

    n_tiles = B // tb
    weight_bytes = (2 * L + 1) * (H * H * wbytes + H * 4)
    cost = pl.CostEstimate(
        flops=2 * B * H * H * (2 * L + 1) + 4 * B * H * L + 2 * B * H,
        transcendentals=B * H * L,
        # Layered mode re-streams all weights once per batch tile.
        bytes_accessed=weight_bytes * (n_tiles if mode == "layered" else 1)
        + 2 * B * H * 4,
    )
    args = (x, prepared["wr_t"], prepared["br"], prepared["w1_t"],
            prepared["b1"], prepared["w2_t"], prepared["b2"])

    # Invariant (never re-fetched) blocks are single-buffered to halve their VMEM.
    # Fall back to default double-buffering once if pipeline_mode is unsupported.
    for inv_bufs in (1, 2):
        inv = {} if inv_bufs == 2 else {"pipeline_mode": pl.Buffered(1)}

        if mode == "resident":
            kernel = functools.partial(_resident_kernel, nlayers=L)
            grid_spec = pltpu.PrefetchScalarGridSpec(
                num_scalar_prefetch=0,
                grid=(n_tiles,),
                in_specs=[
                    pl.BlockSpec((tb, H), lambda i: (i, 0)),               # x (streamed)
                    pl.BlockSpec((H, H), lambda i: (0, 0), **inv),         # wr^T (resident)
                    pl.BlockSpec((1, H), lambda i: (0, 0), **inv),         # br
                    pl.BlockSpec((L, H, H), lambda i: (0, 0, 0), **inv),   # w1^T (resident)
                    pl.BlockSpec((L, 1, H), lambda i: (0, 0, 0), **inv),   # b1
                    pl.BlockSpec((L, H, H), lambda i: (0, 0, 0), **inv),   # w2^T (resident)
                    pl.BlockSpec((L, 1, H), lambda i: (0, 0, 0), **inv),   # b2
                ],
                out_specs=pl.BlockSpec((tb, H), lambda i: (i, 0)),
            )
            dim_sem = ("parallel",)
        else:
            kernel = _layered_kernel
            grid_spec = pltpu.PrefetchScalarGridSpec(
                num_scalar_prefetch=0,
                grid=(n_tiles, L),
                in_specs=[
                    pl.BlockSpec((tb, H), lambda i, l: (i, 0)),             # x
                    pl.BlockSpec((H, H), lambda i, l: (0, 0), **inv),       # wr^T
                    pl.BlockSpec((1, H), lambda i, l: (0, 0), **inv),       # br
                    pl.BlockSpec((None, H, H), lambda i, l: (l, 0, 0)),     # w1^T[l]
                    pl.BlockSpec((None, 1, H), lambda i, l: (l, 0, 0)),     # b1[l]
                    pl.BlockSpec((None, H, H), lambda i, l: (l, 0, 0)),     # w2^T[l]
                    pl.BlockSpec((None, 1, H), lambda i, l: (l, 0, 0)),     # b2[l]
                ],
                out_specs=pl.BlockSpec((tb, H), lambda i, l: (i, 0)),
                scratch_shapes=[pltpu.VMEM((tb, H), wdtype),         # carried activation
                                pltpu.VMEM((tb, H), jnp.float32)],   # residual
            )
            # l axis must stay "arbitrary" (sequential): output revisited across it.
            dim_sem = ("parallel", "arbitrary")

        call = pl.pallas_call(
            kernel,
            out_shape=jax.ShapeDtypeStruct((B, H), x.dtype),
            grid_spec=grid_spec,
            compiler_params=pltpu.CompilerParams(
                dimension_semantics=dim_sem,
                vmem_limit_bytes=_vmem_limit(
                    _vmem_need(mode, tb, H, L, wbytes, inv_bufs=inv_bufs))),
            cost_estimate=cost,
        )
        try:
            return call(*args)
        except Exception:
            if inv_bufs == 2:
                raise
            # pl.Buffered(1) unsupported on this jax version: retry with defaults.
            continue
    raise AssertionError("unreachable")


def make_params(key, hidden_size, nlayers):
    ks = jax.random.split(key, 6)
    scale = 0.02
    return {
        "wr": scale * jax.random.normal(ks[0], (hidden_size, hidden_size), jnp.float32),
        "br": scale * jax.random.normal(ks[1], (hidden_size,), jnp.float32),
        "w1": scale * jax.random.normal(ks[2], (nlayers, hidden_size, hidden_size), jnp.float32),
        "b1": scale * jax.random.normal(ks[3], (nlayers, hidden_size), jnp.float32),
        "w2": scale * jax.random.normal(ks[4], (nlayers, hidden_size, hidden_size), jnp.float32),
        "b2": scale * jax.random.normal(ks[5], (nlayers, hidden_size), jnp.float32),
    }


def reference(x, params):
    # Pure-JAX (f32) reference mirroring the PyTorch forward (eval mode).
    residual = x @ params["wr"].T + params["br"]
    out = x
    for l in range(params["w1"].shape[0]):
        h = out @ params["w1"][l].T + params["b1"][l]
        h = h * jax.nn.sigmoid(h)
        out = h @ params["w2"][l].T + params["b2"][l]
    return out + residual


if __name__ == "__main__":
    key = jax.random.PRNGKey(0)
    kx, kp, kp6 = jax.random.split(key, 3)

    batch, hidden, nlayers = 16, 128, 2
    x = jax.random.normal(kx, (batch, hidden), jnp.float32)
    params = make_params(kp, hidden, nlayers)
    prepared = prepare_params(params)          # one-time transpose + bf16 cast
    y_ref = reference(x, params)

    # 1) Auto plan (small weights -> "resident", static unroll).  bf16 weights =>
    #    loose tolerance against the f32 reference.
    y = jax.block_until_ready(resnet_dense_block(x, prepared))
    assert y.shape == (batch, hidden)
    assert jnp.allclose(y, y_ref, atol=2e-2, rtol=2e-2), float(jnp.max(jnp.abs(y - y_ref)))

    # 2) Per-layer ("layered") plan used when resident weights would exceed the VMEM
    #    budget.  tile_b=8 here is a correctness-coverage choice (exercises the
    #    batch x layer grid and carried scratch), not a perf choice.
    y2 = jax.block_until_ready(resnet_dense_block(x, prepared, tile_b=8, mode="layered"))
    assert jnp.allclose(y2, y_ref, atol=2e-2, rtol=2e-2), float(jnp.max(jnp.abs(y2 - y_ref)))

    # 3) nlayers > _UNROLL_MAX_LAYERS exercises the resident fori_loop (dynamic
    #    layer-index) path.
    params6 = make_params(kp6, hidden, 6)
    prepared6 = prepare_params(params6)
    y3_ref = reference(x, params6)
    y3 = jax.block_until_ready(resnet_dense_block(x, prepared6, mode="resident"))
    assert jnp.allclose(y3, y3_ref, atol=2e-2, rtol=2e-2), float(jnp.max(jnp.abs(y3 - y3_ref)))

    print("KERNEL_OK")
</pallas_src>

<mosaic_0001>
module attributes {stable_mosaic.version = 11 : i64} {
  func.func @_resident_kernel(%arg0: i32, %arg1: memref<16x128xf32, #tpu.memory_space<vmem>>, %arg2: memref<128x128xbf16, #tpu.memory_space<vmem>>, %arg3: memref<1x128xf32, #tpu.memory_space<vmem>>, %arg4: memref<2x128x128xbf16, #tpu.memory_space<vmem>>, %arg5: memref<2x1x128xf32, #tpu.memory_space<vmem>>, %arg6: memref<2x128x128xbf16, #tpu.memory_space<vmem>>, %arg7: memref<2x1x128xf32, #tpu.memory_space<vmem>>, %arg8: memref<16x128xf32, #tpu.memory_space<vmem>>) attributes {dimension_semantics = [#tpu.dimension_semantics<parallel>], iteration_bounds = array<i64: 1>, scalar_prefetch = 0 : i64, scratch_operands = 0 : i64, tpu.core_type = #tpu.core_type<tc>, window_params = [{transform_indices = @transform_0, window_bounds = array<i64: 16, 128>}, {pipeline_mode = #tpu.pipeline_mode<synchronous>, transform_indices = @transform_1, window_bounds = array<i64: 128, 128>}, {pipeline_mode = #tpu.pipeline_mode<synchronous>, transform_indices = @transform_2, window_bounds = array<i64: 1, 128>}, {pipeline_mode = #tpu.pipeline_mode<synchronous>, transform_indices = @transform_3, window_bounds = array<i64: 2, 128, 128>}, {pipeline_mode = #tpu.pipeline_mode<synchronous>, transform_indices = @transform_4, window_bounds = array<i64: 2, 1, 128>}, {pipeline_mode = #tpu.pipeline_mode<synchronous>, transform_indices = @transform_5, window_bounds = array<i64: 2, 128, 128>}, {pipeline_mode = #tpu.pipeline_mode<synchronous>, transform_indices = @transform_6, window_bounds = array<i64: 2, 1, 128>}, {transform_indices = @transform_7, window_bounds = array<i64: 16, 128>}]} {
    %c0 = arith.constant 0 : index
    %c0_0 = arith.constant 0 : index
    %0 = vector.load %arg1[%c0, %c0_0] : memref<16x128xf32, #tpu.memory_space<vmem>>, vector<16x128xf32>
    %c0_1 = arith.constant 0 : index
    %c0_2 = arith.constant 0 : index
    %1 = vector.load %arg2[%c0_1, %c0_2] : memref<128x128xbf16, #tpu.memory_space<vmem>>, vector<128x128xbf16>
    %c0_3 = arith.constant 0 : index
    %c0_4 = arith.constant 0 : index
    %2 = vector.load %arg3[%c0_3, %c0_4] : memref<1x128xf32, #tpu.memory_space<vmem>>, vector<1x128xf32>
    %3 = arith.truncf %0 : vector<16x128xf32> to vector<16x128xbf16>
    %cst = arith.constant dense<0.000000e+00> : vector<16x128xf32>
    %4 = tpu.matmul %3, %1, %cst {dimension_numbers = #tpu.dot_dimension_numbers<[1], [0], [0], [1], [0, 0, 1, 1], [], []>} : vector<16x128xbf16>, vector<128x128xbf16>, vector<16x128xf32> -> vector<16x128xf32>
    %5 = vector.broadcast %2 : vector<1x128xf32> to vector<16x128xf32>
    %6 = arith.addf %4, %5 : vector<16x128xf32>
    %c0_5 = arith.constant 0 : index
    %c0_6 = arith.constant 0 : index
    %c0_7 = arith.constant 0 : index
    %7 = vector.load %arg4[%c0_5, %c0_6, %c0_7] : memref<2x128x128xbf16, #tpu.memory_space<vmem>>, vector<1x128x128xbf16>
    %8 = vector.shape_cast %7 : vector<1x128x128xbf16> to vector<128x128xbf16>
    %c0_8 = arith.constant 0 : index
    %c0_9 = arith.constant 0 : index
    %c0_10 = arith.constant 0 : index
    %9 = vector.load %arg5[%c0_8, %c0_9, %c0_10] : memref<2x1x128xf32, #tpu.memory_space<vmem>>, vector<1x1x128xf32>
    %10 = vector.shape_cast %9 : vector<1x1x128xf32> to vector<1x128xf32>
    %11 = arith.truncf %0 : vector<16x128xf32> to vector<16x128xbf16>
    %cst_11 = arith.constant dense<0.000000e+00> : vector<16x128xf32>
    %12 = tpu.matmul %11, %8, %cst_11 {dimension_numbers = #tpu.dot_dimension_numbers<[1], [0], [0], [1], [0, 0, 1, 1], [], []>} : vector<16x128xbf16>, vector<128x128xbf16>, vector<16x128xf32> -> vector<16x128xf32>
    %13 = vector.broadcast %10 : vector<1x128xf32> to vector<16x128xf32>
    %14 = arith.addf %12, %13 : vector<16x128xf32>
    %15 = arith.negf %14 : vector<16x128xf32>
    %16 = math.exp %15 : vector<16x128xf32>
    %cst_12 = arith.constant 1.000000e+00 : f32
    %17 = vector.broadcast %cst_12 : f32 to vector<16x128xf32>
    %18 = arith.addf %17, %16 : vector<16x128xf32>
    %19 = arith.divf %17, %18 : vector<16x128xf32>
    %20 = arith.mulf %14, %19 : vector<16x128xf32>
    %c0_13 = arith.constant 0 : index
    %c0_14 = arith.constant 0 : index
    %c0_15 = arith.constant 0 : index
    %21 = vector.load %arg6[%c0_13, %c0_14, %c0_15] : memref<2x128x128xbf16, #tpu.memory_space<vmem>>, vector<1x128x128xbf16>
    %22 = vector.shape_cast %21 : vector<1x128x128xbf16> to vector<128x128xbf16>
    %c0_16 = arith.constant 0 : index
    %c0_17 = arith.constant 0 : index
    %c0_18 = arith.constant 0 : index
    %23 = vector.load %arg7[%c0_16, %c0_17, %c0_18] : memref<2x1x128xf32, #tpu.memory_space<vmem>>, vector<1x1x128xf32>
    %24 = vector.shape_cast %23 : vector<1x1x128xf32> to vector<1x128xf32>
    %25 = arith.truncf %20 : vector<16x128xf32> to vector<16x128xbf16>
    %cst_19 = arith.constant dense<0.000000e+00> : vector<16x128xf32>
    %26 = tpu.matmul %25, %22, %cst_19 {dimension_numbers = #tpu.dot_dimension_numbers<[1], [0], [0], [1], [0, 0, 1, 1], [], []>} : vector<16x128xbf16>, vector<128x128xbf16>, vector<16x128xf32> -> vector<16x128xf32>
    %27 = vector.broadcast %24 : vector<1x128xf32> to vector<16x128xf32>
    %28 = arith.addf %26, %27 : vector<16x128xf32>
    %c1 = arith.constant 1 : index
    %c0_20 = arith.constant 0 : index
    %c0_21 = arith.constant 0 : index
    %29 = vector.load %arg4[%c1, %c0_20, %c0_21] : memref<2x128x128xbf16, #tpu.memory_space<vmem>>, vector<1x128x128xbf16>
    %30 = vector.shape_cast %29 : vector<1x128x128xbf16> to vector<128x128xbf16>
    %c1_22 = arith.constant 1 : index
    %c0_23 = arith.constant 0 : index
    %c0_24 = arith.constant 0 : index
    %31 = vector.load %arg5[%c1_22, %c0_23, %c0_24] : memref<2x1x128xf32, #tpu.memory_space<vmem>>, vector<1x1x128xf32>
    %32 = vector.shape_cast %31 : vector<1x1x128xf32> to vector<1x128xf32>
    %33 = arith.truncf %28 : vector<16x128xf32> to vector<16x128xbf16>
    %cst_25 = arith.constant dense<0.000000e+00> : vector<16x128xf32>
    %34 = tpu.matmul %33, %30, %cst_25 {dimension_numbers = #tpu.dot_dimension_numbers<[1], [0], [0], [1], [0, 0, 1, 1], [], []>} : vector<16x128xbf16>, vector<128x128xbf16>, vector<16x128xf32> -> vector<16x128xf32>
    %35 = vector.broadcast %32 : vector<1x128xf32> to vector<16x128xf32>
    %36 = arith.addf %34, %35 : vector<16x128xf32>
    %37 = arith.negf %36 : vector<16x128xf32>
    %38 = math.exp %37 : vector<16x128xf32>
    %cst_26 = arith.constant 1.000000e+00 : f32
    %39 = vector.broadcast %cst_26 : f32 to vector<16x128xf32>
    %40 = arith.addf %39, %38 : vector<16x128xf32>
    %41 = arith.divf %39, %40 : vector<16x128xf32>
    %42 = arith.mulf %36, %41 : vector<16x128xf32>
    %c1_27 = arith.constant 1 : index
    %c0_28 = arith.constant 0 : index
    %c0_29 = arith.constant 0 : index
    %43 = vector.load %arg6[%c1_27, %c0_28, %c0_29] : memref<2x128x128xbf16, #tpu.memory_space<vmem>>, vector<1x128x128xbf16>
    %44 = vector.shape_cast %43 : vector<1x128x128xbf16> to vector<128x128xbf16>
    %c1_30 = arith.constant 1 : index
    %c0_31 = arith.constant 0 : index
    %c0_32 = arith.constant 0 : index
    %45 = vector.load %arg7[%c1_30, %c0_31, %c0_32] : memref<2x1x128xf32, #tpu.memory_space<vmem>>, vector<1x1x128xf32>
    %46 = vector.shape_cast %45 : vector<1x1x128xf32> to vector<1x128xf32>
    %47 = arith.truncf %42 : vector<16x128xf32> to vector<16x128xbf16>
    %cst_33 = arith.constant dense<0.000000e+00> : vector<16x128xf32>
    %48 = tpu.matmul %47, %44, %cst_33 {dimension_numbers = #tpu.dot_dimension_numbers<[1], [0], [0], [1], [0, 0, 1, 1], [], []>} : vector<16x128xbf16>, vector<128x128xbf16>, vector<16x128xf32> -> vector<16x128xf32>
    %49 = vector.broadcast %46 : vector<1x128xf32> to vector<16x128xf32>
    %50 = arith.addf %48, %49 : vector<16x128xf32>
    %51 = arith.addf %50, %6 : vector<16x128xf32>
    %c0_34 = arith.constant 0 : index
    %c0_35 = arith.constant 0 : index
    %52 = vector.load %arg8[%c0_34, %c0_35] : memref<16x128xf32, #tpu.memory_space<vmem>>, vector<16x128xf32>
    tpu.vector_store %arg8[%c0_34, %c0_35], %51 {strides = array<i32>} : memref<16x128xf32, #tpu.memory_space<vmem>>, vector<16x128xf32>,
    return
  }
  func.func @transform_0(%arg0: i32) -> (i32, i32) {
    %c0_i32 = arith.constant 0 : i32
    %c0_i32_0 = arith.constant 0 : i32
    return %arg0, %c0_i32 : i32, i32
  }
  func.func @transform_1(%arg0: i32) -> (i32, i32) {
    %c0_i32 = arith.constant 0 : i32
    %c0_i32_0 = arith.constant 0 : i32
    %c0_i32_1 = arith.constant 0 : i32
    return %c0_i32, %c0_i32_0 : i32, i32
  }
  func.func @transform_2(%arg0: i32) -> (i32, i32) {
    %c0_i32 = arith.constant 0 : i32
    %c0_i32_0 = arith.constant 0 : i32
    %c0_i32_1 = arith.constant 0 : i32
    return %c0_i32, %c0_i32_0 : i32, i32
  }
  func.func @transform_3(%arg0: i32) -> (i32, i32, i32) {
    %c0_i32 = arith.constant 0 : i32
    %c0_i32_0 = arith.constant 0 : i32
    %c0_i32_1 = arith.constant 0 : i32
    %c0_i32_2 = arith.constant 0 : i32
    return %c0_i32, %c0_i32_0, %c0_i32_1 : i32, i32, i32
  }
  func.func @transform_4(%arg0: i32) -> (i32, i32, i32) {
    %c0_i32 = arith.constant 0 : i32
    %c0_i32_0 = arith.constant 0 : i32
    %c0_i32_1 = arith.constant 0 : i32
    %c0_i32_2 = arith.constant 0 : i32
    return %c0_i32, %c0_i32_0, %c0_i32_1 : i32, i32, i32
  }
  func.func @transform_5(%arg0: i32) -> (i32, i32, i32) {
    %c0_i32 = arith.constant 0 : i32
    %c0_i32_0 = arith.constant 0 : i32
    %c0_i32_1 = arith.constant 0 : i32
    %c0_i32_2 = arith.constant 0 : i32
    return %c0_i32, %c0_i32_0, %c0_i32_1 : i32, i32, i32
  }
  func.func @transform_6(%arg0: i32) -> (i32, i32, i32) {
    %c0_i32 = arith.constant 0 : i32
    %c0_i32_0 = arith.constant 0 : i32
    %c0_i32_1 = arith.constant 0 : i32
    %c0_i32_2 = arith.constant 0 : i32
    return %c0_i32, %c0_i32_0, %c0_i32_1 : i32, i32, i32
  }
  func.func @transform_7(%arg0: i32) -> (i32, i32) {
    %c0_i32 = arith.constant 0 : i32
    %c0_i32_0 = arith.constant 0 : i32
    return %arg0, %c0_i32 : i32, i32
  }
}

module attributes {stable_mosaic.version = 11 : i64} {
  func.func @_resident_kernel(%arg0: i32, %arg1: memref<16x128xf32, #tpu.memory_space<vmem>>, %arg2: memref<128x128xbf16, #tpu.memory_space<vmem>>, %arg3: memref<1x128xf32, #tpu.memory_space<vmem>>, %arg4: memref<2x128x128xbf16, #tpu.memory_space<vmem>>, %arg5: memref<2x1x128xf32, #tpu.memory_space<vmem>>, %arg6: memref<2x128x128xbf16, #tpu.memory_space<vmem>>, %arg7: memref<2x1x128xf32, #tpu.memory_space<vmem>>, %arg8: memref<16x128xf32, #tpu.memory_space<vmem>>) attributes {dimension_semantics = [#tpu.dimension_semantics<parallel>], iteration_bounds = array<i64: 1>, scalar_prefetch = 0 : i64, scratch_operands = 0 : i64, tpu.core_type = #tpu.core_type<tc>, window_params = [{transform_indices = @transform_0, window_bounds = array<i64: 16, 128>}, {pipeline_mode = #tpu.pipeline_mode<synchronous>, transform_indices = @transform_1, window_bounds = array<i64: 128, 128>}, {pipeline_mode = #tpu.pipeline_mode<synchronous>, transform_indices = @transform_2, window_bounds = array<i64: 1, 128>}, {pipeline_mode = #tpu.pipeline_mode<synchronous>, transform_indices = @transform_3, window_bounds = array<i64: 2, 128, 128>}, {pipeline_mode = #tpu.pipeline_mode<synchronous>, transform_indices = @transform_4, window_bounds = array<i64: 2, 1, 128>}, {pipeline_mode = #tpu.pipeline_mode<synchronous>, transform_indices = @transform_5, window_bounds = array<i64: 2, 128, 128>}, {pipeline_mode = #tpu.pipeline_mode<synchronous>, transform_indices = @transform_6, window_bounds = array<i64: 2, 1, 128>}, {transform_indices = @transform_7, window_bounds = array<i64: 16, 128>}]} {
    %c0 = arith.constant 0 : index
    %c0_0 = arith.constant 0 : index
    %0 = vector.load %arg1[%c0, %c0_0] : memref<16x128xf32, #tpu.memory_space<vmem>>, vector<16x128xf32>
    %c0_1 = arith.constant 0 : index
    %c0_2 = arith.constant 0 : index
    %1 = vector.load %arg2[%c0_1, %c0_2] : memref<128x128xbf16, #tpu.memory_space<vmem>>, vector<128x128xbf16>
    %c0_3 = arith.constant 0 : index
    %c0_4 = arith.constant 0 : index
    %2 = vector.load %arg3[%c0_3, %c0_4] : memref<1x128xf32, #tpu.memory_space<vmem>>, vector<1x128xf32>
    %3 = arith.truncf %0 : vector<16x128xf32> to vector<16x128xbf16>
    %cst = arith.constant dense<0.000000e+00> : vector<16x128xf32>
    %4 = tpu.matmul %3, %1, %cst {dimension_numbers = #tpu.dot_dimension_numbers<[1], [0], [0], [1], [0, 0, 1, 1], [], []>} : vector<16x128xbf16>, vector<128x128xbf16>, vector<16x128xf32> -> vector<16x128xf32>
    %5 = vector.broadcast %2 : vector<1x128xf32> to vector<16x128xf32>
    %6 = arith.addf %4, %5 : vector<16x128xf32>
    %c0_5 = arith.constant 0 : index
    %c0_6 = arith.constant 0 : index
    %c0_7 = arith.constant 0 : index
    %7 = vector.load %arg4[%c0_5, %c0_6, %c0_7] : memref<2x128x128xbf16, #tpu.memory_space<vmem>>, vector<1x128x128xbf16>
    %8 = vector.shape_cast %7 : vector<1x128x128xbf16> to vector<128x128xbf16>
    %c0_8 = arith.constant 0 : index
    %c0_9 = arith.constant 0 : index
    %c0_10 = arith.constant 0 : index
    %9 = vector.load %arg5[%c0_8, %c0_9, %c0_10] : memref<2x1x128xf32, #tpu.memory_space<vmem>>, vector<1x1x128xf32>
    %10 = vector.shape_cast %9 : vector<1x1x128xf32> to vector<1x128xf32>
    %11 = arith.truncf %0 : vector<16x128xf32> to vector<16x128xbf16>
    %cst_11 = arith.constant dense<0.000000e+00> : vector<16x128xf32>
    %12 = tpu.matmul %11, %8, %cst_11 {dimension_numbers = #tpu.dot_dimension_numbers<[1], [0], [0], [1], [0, 0, 1, 1], [], []>} : vector<16x128xbf16>, vector<128x128xbf16>, vector<16x128xf32> -> vector<16x128xf32>
    %13 = vector.broadcast %10 : vector<1x128xf32> to vector<16x128xf32>
    %14 = arith.addf %12, %13 : vector<16x128xf32>
    %15 = arith.negf %14 : vector<16x128xf32>
    %16 = math.exp %15 : vector<16x128xf32>
    %cst_12 = arith.constant 1.000000e+00 : f32
    %17 = vector.broadcast %cst_12 : f32 to vector<16x128xf32>
    %18 = arith.addf %17, %16 : vector<16x128xf32>
    %19 = arith.divf %17, %18 : vector<16x128xf32>
    %20 = arith.mulf %14, %19 : vector<16x128xf32>
    %c0_13 = arith.constant 0 : index
    %c0_14 = arith.constant 0 : index
    %c0_15 = arith.constant 0 : index
    %21 = vector.load %arg6[%c0_13, %c0_14, %c0_15] : memref<2x128x128xbf16, #tpu.memory_space<vmem>>, vector<1x128x128xbf16>
    %22 = vector.shape_cast %21 : vector<1x128x128xbf16> to vector<128x128xbf16>
    %c0_16 = arith.constant 0 : index
    %c0_17 = arith.constant 0 : index
    %c0_18 = arith.constant 0 : index
    %23 = vector.load %arg7[%c0_16, %c0_17, %c0_18] : memref<2x1x128xf32, #tpu.memory_space<vmem>>, vector<1x1x128xf32>
    %24 = vector.shape_cast %23 : vector<1x1x128xf32> to vector<1x128xf32>
    %25 = arith.truncf %20 : vector<16x128xf32> to vector<16x128xbf16>
    %cst_19 = arith.constant dense<0.000000e+00> : vector<16x128xf32>
    %26 = tpu.matmul %25, %22, %cst_19 {dimension_numbers = #tpu.dot_dimension_numbers<[1], [0], [0], [1], [0, 0, 1, 1], [], []>} : vector<16x128xbf16>, vector<128x128xbf16>, vector<16x128xf32> -> vector<16x128xf32>
    %27 = vector.broadcast %24 : vector<1x128xf32> to vector<16x128xf32>
    %28 = arith.addf %26, %27 : vector<16x128xf32>
    %c1 = arith.constant 1 : index
    %c0_20 = arith.constant 0 : index
    %c0_21 = arith.constant 0 : index
    %29 = vector.load %arg4[%c1, %c0_20, %c0_21] : memref<2x128x128xbf16, #tpu.memory_space<vmem>>, vector<1x128x128xbf16>
    %30 = vector.shape_cast %29 : vector<1x128x128xbf16> to vector<128x128xbf16>
    %c1_22 = arith.constant 1 : index
    %c0_23 = arith.constant 0 : index
    %c0_24 = arith.constant 0 : index
    %31 = vector.load %arg5[%c1_22, %c0_23, %c0_24] : memref<2x1x128xf32, #tpu.memory_space<vmem>>, vector<1x1x128xf32>
    %32 = vector.shape_cast %31 : vector<1x1x128xf32> to vector<1x128xf32>
    %33 = arith.truncf %28 : vector<16x128xf32> to vector<16x128xbf16>
    %cst_25 = arith.constant dense<0.000000e+00> : vector<16x128xf32>
    %34 = tpu.matmul %33, %30, %cst_25 {dimension_numbers = #tpu.dot_dimension_numbers<[1], [0], [0], [1], [0, 0, 1, 1], [], []>} : vector<16x128xbf16>, vector<128x128xbf16>, vector<16x128xf32> -> vector<16x128xf32>
    %35 = vector.broadcast %32 : vector<1x128xf32> to vector<16x128xf32>
    %36 = arith.addf %34, %35 : vector<16x128xf32>
    %37 = arith.negf %36 : vector<16x128xf32>
    %38 = math.exp %37 : vector<16x128xf32>
    %cst_26 = arith.constant 1.000000e+00 : f32
    %39 = vector.broadcast %cst_26 : f32 to vector<16x128xf32>
    %40 = arith.addf %39, %38 : vector<16x128xf32>
    %41 = arith.divf %39, %40 : vector<16x128xf32>
    %42 = arith.mulf %36, %41 : vector<16x128xf32>
    %c1_27 = arith.constant 1 : index
    %c0_28 = arith.constant 0 : index
    %c0_29 = arith.constant 0 : index
    %43 = vector.load %arg6[%c1_27, %c0_28, %c0_29] : memref<2x128x128xbf16, #tpu.memory_space<vmem>>, vector<1x128x128xbf16>
    %44 = vector.shape_cast %43 : vector<1x128x128xbf16> to vector<128x128xbf16>
    %c1_30 = arith.constant 1 : index
    %c0_31 = arith.constant 0 : index
    %c0_32 = arith.constant 0 : index
    %45 = vector.load %arg7[%c1_30, %c0_31, %c0_32] : memref<2x1x128xf32, #tpu.memory_space<vmem>>, vector<1x1x128xf32>
    %46 = vector.shape_cast %45 : vector<1x1x128xf32> to vector<1x128xf32>
    %47 = arith.truncf %42 : vector<16x128xf32> to vector<16x128xbf16>
    %cst_33 = arith.constant dense<0.000000e+00> : vector<16x128xf32>
    %48 = tpu.matmul %47, %44, %cst_33 {dimension_numbers = #tpu.dot_dimension_numbers<[1], [0], [0], [1], [0, 0, 1, 1], [], []>} : vector<16x128xbf16>, vector<128x128xbf16>, vector<16x128xf32> -> vector<16x128xf32>
    %49 = vector.broadcast %46 : vector<1x128xf32> to vector<16x128xf32>
    %50 = arith.addf %48, %49 : vector<16x128xf32>
    %51 = arith.addf %50, %6 : vector<16x128xf32>
    %c0_34 = arith.constant 0 : index
    %c0_35 = arith.constant 0 : index
    %52 = vector.load %arg8[%c0_34, %c0_35] : memref<16x128xf32, #tpu.memory_space<vmem>>, vector<16x128xf32>
    tpu.vector_store %arg8[%c0_34, %c0_35], %51 {strides = array<i32>} : memref<16x128xf32, #tpu.memory_space<vmem>>, vector<16x128xf32>,
    return
  }
  func.func @transform_0(%arg0: i32) -> (i32, i32) {
    %c0_i32 = arith.constant 0 : i32
    %c0_i32_0 = arith.constant 0 : i32
    return %arg0, %c0_i32 : i32, i32
  }
  func.func @transform_1(%arg0: i32) -> (i32, i32) {
    %c0_i32 = arith.constant 0 : i32
    %c0_i32_0 = arith.constant 0 : i32
    %c0_i32_1 = arith.constant 0 : i32
    return %c0_i32, %c0_i32_0 : i32, i32
  }
  func.func @transform_2(%arg0: i32) -> (i32, i32) {
    %c0_i32 = arith.constant 0 : i32
    %c0_i32_0 = arith.constant 0 : i32
    %c0_i32_1 = arith.constant 0 : i32
    return %c0_i32, %c0_i32_0 : i32, i32
  }
  func.func @transform_3(%arg0: i32) -> (i32, i32, i32) {
    %c0_i32 = arith.constant 0 : i32
    %c0_i32_0 = arith.constant 0 : i32
    %c0_i32_1 = arith.constant 0 : i32
    %c0_i32_2 = arith.constant 0 : i32
    return %c0_i32, %c0_i32_0, %c0_i32_1 : i32, i32, i32
  }
  func.func @transform_4(%arg0: i32) -> (i32, i32, i32) {
    %c0_i32 = arith.constant 0 : i32
    %c0_i32_0 = arith.constant 0 : i32
    %c0_i32_1 = arith.constant 0 : i32
    %c0_i32_2 = arith.constant 0 : i32
    return %c0_i32, %c0_i32_0, %c0_i32_1 : i32, i32, i32
  }
  func.func @transform_5(%arg0: i32) -> (i32, i32, i32) {
    %c0_i32 = arith.constant 0 : i32
    %c0_i32_0 = arith.constant 0 : i32
    %c0_i32_1 = arith.constant 0 : i32
    %c0_i32_2 = arith.constant 0 : i32
    return %c0_i32, %c0_i32_0, %c0_i32_1 : i32, i32, i32
  }
  func.func @transform_6(%arg0: i32) -> (i32, i32, i32) {
    %c0_i32 = arith.constant 0 : i32
    %c0_i32_0 = arith.constant 0 : i32
    %c0_i32_1 = arith.constant 0 : i32
    %c0_i32_2 = arith.constant 0 : i32
    return %c0_i32, %c0_i32_0, %c0_i32_1 : i32, i32, i32
  }
  func.func @transform_7(%arg0: i32) -> (i32, i32) {
    %c0_i32 = arith.constant 0 : i32
    %c0_i32_0 = arith.constant 0 : i32
    return %arg0, %c0_i32 : i32, i32
  }
}

</mosaic_0001>

<bundles_post_ra>
// kernel: tpu_custom_call.1
= control target key start
LH: loop header
LB: loop body
LE: loop exit
PB: predicated region body
PF: predicated region fallthrough
CT: control target
= control target key end

     0   :  { %12 = vsyncpa [#allocation3], 0  ;;  %s1291_s0 = inlined_call_operand.hbm [shape: f32[16,128], index: 0, kind: input, shape index: {}]   ;;  %s1292_s1 = inlined_call_operand.hbm [shape: bf16[128,128], index: 1, kind: input, shape index: {}]   ;;  %s1293_s2 = inlined_call_operand.vmem [shape: f32[1,128], index: 2, kind: input, shape index: {}]   ;;  %s1294_s3 = inlined_call_operand.hbm [shape: bf16[2,128,128], index: 3, kind: input, shape index: {}]   ;;  %s1295_s4 = inlined_call_operand.vmem [shape: f32[2,1,128], index: 4, kind: input, shape index: {}]   ;;  %s1296_s5 = inlined_call_operand.hbm [shape: bf16[2,128,128], index: 5, kind: input, shape index: {}]   ;;  %s1297_s6 = inlined_call_operand.vmem [shape: f32[2,1,128], index: 6, kind: input, shape index: {}]   ;;  %s1298_s7 = inlined_call_operand.hbm [shape: f32[16,128], index: 7, kind: output, shape index: {}]  }
   0x1   :  { %13 = vsyncpa [#allocation6], 0 }
   0x2   :  { %14 = vsyncpa [#allocation9], 0 }
   0x3   :  { %15 = vsyncpa [#allocation4], 0  ;;  %s1093_s24 = smov [#allocation5]   ;;  %s975_s28 = scalar_lea.hbm %s1292_s1, 1024 }
   0x4   :  { %s33_s25 = sshll.u32 %s1093_s24, 4  ;;  %p976_p0 = scmp.ne.s32.totalorder %s1292_s1, %s975_s28  ;;  %s34_s25 = int_to_ptr.vmem [resolvable:$true] %s33_s25 }
   0x5   :  { %p979_p1 = scmp.lt.u32.totalorder %s975_s28, %s1292_s1 }
   0x7   :  { %p981_p2 = pnand %p979_p1, %p976_p0 }
   0x9   :  { %984 = shalt.err (!%p981_p2)
}
   0xa   :  { %s985_s10 = scalar_lea.vmem %s34_s25, 1024  ;;  %p990_p4 = scmp.lt.s32.totalorder %s34_s25, %s34_s25 }
   0xb   :  { %p986_p3 = scmp.ne.s32.totalorder %s34_s25, %s985_s10  ;;  %p991_p5 = scmp.lt.s32.totalorder %s985_s10, %s985_s10 }
   0xd   :  { %p992_p6 = por %p991_p5, %p990_p4 }
   0xf   :  { %p993_p7 = pnand %p992_p6, %p986_p3 }
  0x11   :  { %996 = shalt.err (!%p993_p7)
}
  0x12   :  { %s1094_s11 = smov 64   ;;  %s1095_s12 = smov 4  }
  0x13   :  { %39 = dma.hbm_to_vmem [thread:$0]  %s1292_s1, 1024, %s34_s25, [#allocation6], %s1094_s11, %s1094_s11, %s1095_s12  }
  0x14   :  { %s1096_s15 = smov [#allocation2]   ;;  %s997_s19 = scalar_lea.hbm %s1291_s0, 256 }
  0x15   :  { %s21_s16 = sshll.u32 %s1096_s15, 4  ;;  %p998_p8 = scmp.ne.s32.totalorder %s1291_s0, %s997_s19  ;;  %s22_s16 = int_to_ptr.vmem [resolvable:$true] %s21_s16 }
  0x16   :  { %p1001_p9 = scmp.lt.u32.totalorder %s997_s19, %s1291_s0 }
  0x18   :  { %p1003_p10 = pnand %p1001_p9, %p998_p8 }
  0x1a   :  { %1006 = shalt.err (!%p1003_p10)
}
  0x1b   :  { %s1007_s24 = scalar_lea.vmem %s22_s16, 256  ;;  %p1012_p12 = scmp.lt.s32.totalorder %s22_s16, %s22_s16 }
  0x1c   :  { %p1008_p11 = scmp.ne.s32.totalorder %s22_s16, %s1007_s24  ;;  %p1013_p13 = scmp.lt.s32.totalorder %s1007_s24, %s1007_s24 }
  0x1e   :  { %p1014_p0 = por %p1013_p13, %p1012_p12 }
  0x20   :  { %p1015_p1 = pnand %p1014_p0, %p1008_p11 }
  0x22   :  { %1018 = shalt.err (!%p1015_p1)
}
  0x23   :  { %s1097_s1 = smov 128   ;;  %s1098_s25 = smov 8  }
  0x24   :  { %27 = dma.hbm_to_vmem [thread:$0]  %s1291_s0, 256, %s22_s16, [#allocation3], %s1097_s1, %s1097_s1, %s1098_s25  }
  0x25   :  { %s1099_s28 = smov [#allocation7]   ;;  %s1100_s30 = smov [#allocation8]  }
  0x26   :  { %s47_s29 = sshll.u32 %s1099_s28, 4  ;;  %s61_s8 = sshll.u32 %s1100_s30, 4  ;;  %s48_s29 = int_to_ptr.vmem [resolvable:$true] %s47_s29  ;;  %s1174_s8 = int_to_ptr.vmem [resolvable:$true] %s61_s8 }
  0x27   :  { %s1019_s13 = scalar_lea.hbm %s1294_s3, 2048 }
  0x28   :  { %p1020_p2 = scmp.ne.s32.totalorder %s1294_s3, %s1019_s13  ;;  %p1023_p3 = scmp.lt.u32.totalorder %s1019_s13, %s1294_s3 }
  0x2a   :  { %p1025_p4 = pnand %p1023_p3, %p1020_p2 }
  0x2c   :  { %1028 = shalt.err (!%p1025_p4)
}
  0x2d   :  { %s1029_s0 = scalar_lea.vmem %s48_s29, 2048  ;;  %p1034_p6 = scmp.lt.s32.totalorder %s48_s29, %s48_s29 }
  0x2e   :  { %p1030_p5 = scmp.ne.s32.totalorder %s48_s29, %s1029_s0  ;;  %p1035_p7 = scmp.lt.s32.totalorder %s1029_s0, %s1029_s0 }
  0x30   :  { %p1036_p8 = por %p1035_p7, %p1034_p6 }
  0x32   :  { %p1037_p9 = pnand %p1036_p8, %p1030_p5 }
  0x34   :  { %1040 = shalt.err (!%p1037_p9)
}
  0x35   :  { %53 = dma.hbm_to_vmem [thread:$0]  %s1294_s3, 2048, %s48_s29, [#allocation6], %s1094_s11, %s1094_s11, %s1095_s12  }
  0x36   :  { %s1041_s22 = scalar_lea.hbm %s1296_s5, 2048 }
  0x37   :  { %p1042_p10 = scmp.ne.s32.totalorder %s1296_s5, %s1041_s22  ;;  %p1045_p11 = scmp.lt.u32.totalorder %s1041_s22, %s1296_s5 }
  0x39   :  { %p1047_p12 = pnand %p1045_p11, %p1042_p10 }
  0x3b   :  { %1050 = shalt.err (!%p1047_p12)
}
  0x3c   :  { %s1051_s28 = scalar_lea.vmem %s1174_s8, 2048  ;;  %p1056_p0 = scmp.lt.s32.totalorder %s1174_s8, %s1174_s8 }
  0x3d   :  { %p1052_p13 = scmp.ne.s32.totalorder %s1174_s8, %s1051_s28  ;;  %p1057_p1 = scmp.lt.s32.totalorder %s1051_s28, %s1051_s28 }
  0x3f   :  { %p1058_p2 = por %p1057_p1, %p1056_p0 }
  0x41   :  { %p1059_p3 = pnand %p1058_p2, %p1052_p13 }
  0x43   :  { %1062 = shalt.err (!%p1059_p3)
}
  0x44   :  { %67 = dma.hbm_to_vmem [thread:$0]  %s1296_s5, 2048, %s1174_s8, [#allocation9], %s1094_s11, %s1094_s11, %s1095_s12  }
  0x45   :  { %1085 = dma.done.wait [#allocation3], 256  }
  0x46   :  { %1086 = vsyncadd [#allocation3], 4294967040 }
  0x47   :  { %1087 = dma.done.wait [#allocation6], 3072  }
  0x48   :  { %1088 = vsyncadd [#allocation6], 4294964224 }
  0x49   :  { %1089 = dma.done.wait [#allocation9], 2048  }
  0x4a   :  { %1090 = vsyncadd [#allocation9], 4294965248  ;;  %v1101_v0 = vmov 0.0   ;;  %vm1102_vm0 = vmmov 0   ;;  %v919_v1 = vld [vmem:[#allocation7] sm:$0xff]   ;;  %v920_v2 = vld [vmem:[#allocation7 + $0x8] sm:$0xff]  }
  0x4b   :  { %820 = vmatprep.subr.bf16.mxu1 %v1101_v0  ;;  %836 = vmatprep.mubr.msk.bf16.mxu1 %vm1102_vm0, %v1101_v0  ;;  %v921_v3 = vld [vmem:[#allocation7 + $0x10] sm:$0xff]   ;;  %v927_v4 = vld [vmem:[#allocation5] sm:$0xff]   ;;  %v922_v5 = vld [vmem:[#allocation7 + $0x18] sm:$0xff]   ;;  %s1103_s15 = smov [#allocation10]  }
  0x4c   :  { %800 = vmatprep.subr.bf16.mxu0 %v1101_v0  ;;  %816 = vmatprep.mubr.msk.bf16.mxu0 %vm1102_vm0, %v1101_v0  ;;  %v928_v6 = vld [vmem:[#allocation5 + $0x8] sm:$0xff]   ;;  %v923_v7 = vld [vmem:[#allocation7 + $0x20] sm:$0xff]   ;;  %v929_v8 = vld [vmem:[#allocation5 + $0x10] sm:$0xff]   ;;  %s690_s17 = sshll.u32 %s1103_s15, 4  ;;  %s691_s17 = int_to_ptr.vmem [resolvable:$true] %s690_s17 }
  0x4d   :  { %821 = vmatpush3.bf16.msra.mxu1 %v919_v1  ;;  %801 = vmatpush3.bf16.msra.mxu0 %v927_v4  ;;  %v924_v9 = vld [vmem:[#allocation7 + $0x28] sm:$0xff]   ;;  %v930_v10 = vld [vmem:[#allocation5 + $0x18] sm:$0xff]   ;;  %v925_v11 = vld [vmem:[#allocation7 + $0x30] sm:$0xff]   ;;  %s1063_s18 = scalar_lea.vmem %s691_s17, 256  ;;  %p1068_p5 = scmp.lt.s32.totalorder %s691_s17, %s691_s17 }
  0x4e   :  { %822 = vmatprep.subr.bf16.mxu1 %v1101_v0  ;;  %802 = vmatprep.subr.bf16.mxu0 %v1101_v0  ;;  %v931_v12 = vld [vmem:[#allocation5 + $0x20] sm:$0xff]   ;;  %v926_v13 = vld [vmem:[#allocation7 + $0x38] sm:$0xff]   ;;  %v83_v14 = vld [vmem:[#allocation2] sm:$0xff]  ;;  %p1064_p4 = scmp.ne.s32.totalorder %s691_s17, %s1063_s18  ;;  %p1069_p6 = scmp.lt.s32.totalorder %s1063_s18, %s1063_s18 }
  0x4f   :  { %v84_v15 = vld [vmem:[#allocation2 + $0x8] sm:$0xff]  ;;  %v932_v16 = vld [vmem:[#allocation5 + $0x28] sm:$0xff]   ;;  %v933_v18 = vld [vmem:[#allocation5 + $0x30] sm:$0xff]  }
  0x50   :  { %v102_v17 = vpack.c.bf16 %v84_v15, %v83_v14  ;;  %v934_v19 = vld [vmem:[#allocation5 + $0x38] sm:$0xff]   ;;  %v935_v20 = vld [vmem:[#allocation8] sm:$0xff]   ;;  %v936_v21 = vld [vmem:[#allocation8 + $0x8] sm:$0xff]   ;;  %p1070_p7 = por %p1069_p6, %p1068_p5 }
  0x51   :  { %823 = vmatpush3.bf16.msra.mxu1 %v920_v2  ;;  %803 = vmatpush3.bf16.msra.mxu0 %v928_v6  ;;  %v937_v22 = vld [vmem:[#allocation8 + $0x10] sm:$0xff]   ;;  %v938_v23 = vld [vmem:[#allocation8 + $0x18] sm:$0xff]   ;;  %v939_v24 = vld [vmem:[#allocation8 + $0x20] sm:$0xff]  }
  0x52   :  { %824 = vmatprep.subr.bf16.mxu1 %v1101_v0  ;;  %804 = vmatprep.subr.bf16.mxu0 %v1101_v0  ;;  %v940_v25 = vld [vmem:[#allocation8 + $0x28] sm:$0xff]   ;;  %v941_v26 = vld [vmem:[#allocation8 + $0x30] sm:$0xff]   ;;  %v942_v27 = vld [vmem:[#allocation8 + $0x38] sm:$0xff]   ;;  %p1071_p8 = pnand %p1070_p7, %p1064_p4 }
  0x53   :  { %v943_v28 = vld [vmem:[#allocation7 + $0x40] sm:$0xff]   ;;  %v944_v29 = vld [vmem:[#allocation7 + $0x48] sm:$0xff]   ;;  %v945_v30 = vld [vmem:[#allocation7 + $0x50] sm:$0xff]  }
  0x54   :  { %v946_v31 = vld [vmem:[#allocation7 + $0x58] sm:$0xff]   ;;  %v947_v32 = vld [vmem:[#allocation7 + $0x60] sm:$0xff]   ;;  %v948_v33 = vld [vmem:[#allocation7 + $0x68] sm:$0xff]  }
  0x55   :  { %825 = vmatpush3.bf16.msra.mxu1 %v921_v3  ;;  %805 = vmatpush3.bf16.msra.mxu0 %v929_v8  ;;  %v713_v34 = vld [vmem:[%s1295_s4] ss:$0 sm:$0xff]  ;;  %v950_v53 = vld [vmem:[#allocation7 + $0x78] sm:$0xff]   ;;  %v951_v62 = vld [vmem:[#allocation8 + $0x40] sm:$0xff]  }
  0x56   :  { %826 = vmatprep.subr.bf16.mxu1 %v1101_v0  ;;  %806 = vmatprep.subr.bf16.mxu0 %v1101_v0  ;;  %v949_v52 = vld [vmem:[#allocation7 + $0x70] sm:$0xff]   ;;  %v952_v63 = vld [vmem:[#allocation8 + $0x48] sm:$0xff]   ;;  %v954_v2 = vld [vmem:[#allocation8 + $0x58] sm:$0xff]  }
  0x57   :  { %v724_v54 = vld [vmem:[%s1297_s6] ss:$0 sm:$0xff]  ;;  %v955_v3 = vld [vmem:[#allocation8 + $0x60] sm:$0xff]   ;;  %v956_v4 = vld [vmem:[#allocation8 + $0x68] sm:$0xff]  }
  0x58   :  { %v953_v1 = vld [vmem:[#allocation8 + $0x50] sm:$0xff]   ;;  %v958_v6 = vld [vmem:[#allocation8 + $0x78] sm:$0xff]  }
  0x59   :  { %827 = vmatpush3.bf16.msra.mxu1 %v922_v5  ;;  %807 = vmatpush3.bf16.msra.mxu0 %v930_v10  ;;  %v957_v5 = vld [vmem:[#allocation8 + $0x70] sm:$0xff]  }
  0x5a   :  { %828 = vmatprep.subr.bf16.mxu1 %v1101_v0  ;;  %808 = vmatprep.subr.bf16.mxu0 %v1101_v0 }
  0x5d   :  { %829 = vmatpush3.bf16.msra.mxu1 %v923_v7  ;;  %809 = vmatpush3.bf16.msra.mxu0 %v931_v12  ;;  %v734_v7 = vld [vmem:[%s1295_s4 + $0x1] ss:$0 sm:$0xff] }
  0x5e   :  { %830 = vmatprep.subr.bf16.mxu1 %v1101_v0  ;;  %810 = vmatprep.subr.bf16.mxu0 %v1101_v0 }
  0x61   :  { %831 = vmatpush3.bf16.msra.mxu1 %v924_v9  ;;  %811 = vmatpush3.bf16.msra.mxu0 %v932_v16 }
  0x62   :  { %832 = vmatprep.subr.bf16.mxu1 %v1101_v0  ;;  %812 = vmatprep.subr.bf16.mxu0 %v1101_v0 }
  0x65   :  { %833 = vmatpush3.bf16.msra.mxu1 %v925_v11  ;;  %813 = vmatpush3.bf16.msra.mxu0 %v933_v18 }
  0x66   :  { %834 = vmatprep.subr.bf16.mxu1 %v1101_v0  ;;  %814 = vmatprep.subr.bf16.mxu0 %v1101_v0 }
  0x69   :  { %835 = vmatpush3.bf16.msra.mxu1 %v926_v13  ;;  %815 = vmatpush3.bf16.msra.mxu0 %v934_v19 }
  0x6a   :  { %860 = vmatprep.subr.bf16.mxu1 %v1101_v0  ;;  %840 = vmatprep.subr.bf16.mxu0 %v1101_v0 }
  0x6c   :  { %837 = vmatmul.mubr.bf16.vlgmr.msra.gmra.mrb[0].mxu1 %v102_v17  ;;  %817 = vmatmul.mubr.bf16.vlgmr.msra.gmra.mrb[0].mxu0 %v102_v17 }
  0x6d   :  { %876 = vmatprep.mubr.msk.bf16.mxu1 %vm1102_vm0, %v1101_v0  ;;  %856 = vmatprep.mubr.msk.bf16.mxu0 %vm1102_vm0, %v1101_v0 }
  0x6e   :  { %841 = vmatpush3.bf16.msra.mxu0 %v935_v20  ;;  %861 = vmatpush3.bf16.msra.mxu1 %v943_v28 }
  0x6f   :  { %842 = vmatprep.subr.bf16.mxu0 %v1101_v0  ;;  %862 = vmatprep.subr.bf16.mxu1 %v1101_v0 }
  0x72   :  { %843 = vmatpush3.bf16.msra.mxu0 %v936_v21  ;;  %863 = vmatpush3.bf16.msra.mxu1 %v944_v29 }
  0x73   :  { %844 = vmatprep.subr.bf16.mxu0 %v1101_v0  ;;  %864 = vmatprep.subr.bf16.mxu1 %v1101_v0 }
  0x76   :  { %845 = vmatpush3.bf16.msra.mxu0 %v937_v22  ;;  %865 = vmatpush3.bf16.msra.mxu1 %v945_v30 }
  0x77   :  { %846 = vmatprep.subr.bf16.mxu0 %v1101_v0  ;;  %866 = vmatprep.subr.bf16.mxu1 %v1101_v0 }
  0x7a   :  { %847 = vmatpush3.bf16.msra.mxu0 %v938_v23  ;;  %867 = vmatpush3.bf16.msra.mxu1 %v946_v31 }
  0x7b   :  { %848 = vmatprep.subr.bf16.mxu0 %v1101_v0  ;;  %868 = vmatprep.subr.bf16.mxu1 %v1101_v0 }
  0x7e   :  { %849 = vmatpush3.bf16.msra.mxu0 %v939_v24  ;;  %869 = vmatpush3.bf16.msra.mxu1 %v947_v32  ;;  %v704_v24 = vld [vmem:[%s1293_s2] ss:$0 sm:$0xff] }
  0x7f   :  { %850 = vmatprep.subr.bf16.mxu0 %v1101_v0  ;;  %870 = vmatprep.subr.bf16.mxu1 %v1101_v0 }
  0x82   :  { %851 = vmatpush3.bf16.msra.mxu0 %v940_v25  ;;  %871 = vmatpush3.bf16.msra.mxu1 %v948_v33  ;;  %v746_v25 = vld [vmem:[%s1297_s6 + $0x1] ss:$0 sm:$0xff] }
  0x83   :  { %852 = vmatprep.subr.bf16.mxu0 %v1101_v0  ;;  %872 = vmatprep.subr.bf16.mxu1 %v1101_v0 }
  0x86   :  { %853 = vmatpush3.bf16.msra.mxu0 %v941_v26  ;;  %873 = vmatpush3.bf16.msra.mxu1 %v949_v52  ;;  %v900_v26 = vadd.f32 %v746_v25, %v704_v24 }
  0x87   :  { %854 = vmatprep.subr.bf16.mxu0 %v1101_v0  ;;  %874 = vmatprep.subr.bf16.mxu1 %v1101_v0 }
  0x8a   :  { %855 = vmatpush3.bf16.msra.mxu0 %v942_v27  ;;  %875 = vmatpush3.bf16.msra.mxu1 %v950_v53 }
  0x8b   :  { %880 = vmatprep.subr.bf16.mxu0 %v1101_v0 }
 0x13f   :  { %v303_v35 = vpop.f32.mrb[0].mxu1 }
 0x140   :  { %v304_v36 = vadd.f32 %v713_v34, %v303_v35  ;;  %v838_v37 = vpop.f32.mrb[1].mxu1 }
 0x141   :  { %v306_v38 = vpop.f32.mrb[2].mxu1 }
 0x142   :  { %v722_v39 = vmul.f32 -1.442695, %v304_v36  ;;  %v307_v40 = vadd.f32 %v713_v34, %v306_v38  ;;  %v839_v41 = vpop.f32.mrb[3].mxu1 }
 0x144   :  { %959 = vpow2.f32 %v722_v39  ;;  %v723_v42 = vmul.f32 -1.442695, %v307_v40 }
 0x146   :  { %961 = vpow2.f32 %v723_v42 }
 0x14e   :  { %v960_v43 = vpop.eup %959 }
 0x14f   :  { %v316_v44 = vadd.f32 1.0, %v960_v43 }
 0x150   :  { %v962_v45 = vpop.eup %961 }
 0x151   :  { %963 = vrcp.f32 %v316_v44  ;;  %v317_v46 = vadd.f32 1.0, %v962_v45 }
 0x153   :  { %965 = vrcp.f32 %v317_v46 }
 0x15b   :  { %v964_v47 = vpop.eup %963 }
 0x15c   :  { %v322_v49 = vmul.f32 %v964_v47, %v304_v36 }
 0x15d   :  { %v966_v48 = vpop.eup %965 }
 0x15e   :  { %v323_v50 = vmul.f32 %v966_v48, %v307_v40 }
 0x160   :  { %v341_v51 = vpack.c.bf16 %v323_v50, %v322_v49 }
 0x162   :  { %857 = vmatmul.mubr.bf16.vlgmr.msra.gmra.mrb[4].mxu0 %v341_v51 }
 0x163   :  { %896 = vmatprep.mubr.msk.bf16.mxu0 %vm1102_vm0, %v1101_v0  ;;  %881 = vmatpush3.bf16.msra.mxu0 %v951_v62 }
 0x164   :  { %882 = vmatprep.subr.bf16.mxu0 %v1101_v0 }
 0x167   :  { %883 = vmatpush3.bf16.msra.mxu0 %v952_v63 }
 0x168   :  { %884 = vmatprep.subr.bf16.mxu0 %v1101_v0 }
 0x16b   :  { %885 = vmatpush3.bf16.msra.mxu0 %v953_v1 }
 0x16c   :  { %886 = vmatprep.subr.bf16.mxu0 %v1101_v0 }
 0x16f   :  { %887 = vmatpush3.bf16.msra.mxu0 %v954_v2 }
 0x170   :  { %888 = vmatprep.subr.bf16.mxu0 %v1101_v0 }
 0x173   :  { %889 = vmatpush3.bf16.msra.mxu0 %v955_v3 }
 0x174   :  { %890 = vmatprep.subr.bf16.mxu0 %v1101_v0 }
 0x177   :  { %891 = vmatpush3.bf16.msra.mxu0 %v956_v4 }
 0x178   :  { %892 = vmatprep.subr.bf16.mxu0 %v1101_v0 }
 0x17b   :  { %893 = vmatpush3.bf16.msra.mxu0 %v957_v5 }
 0x17c   :  { %894 = vmatprep.subr.bf16.mxu0 %v1101_v0 }
 0x17f   :  { %895 = vmatpush3.bf16.msra.mxu0 %v958_v6 }
 0x235   :  { %v430_v55 = vpop.f32.mrb[4].mxu0 }
 0x236   :  { %v858_v56 = vpop.f32.mrb[5].mxu0  ;;  %v431_v58 = vadd.f32 %v724_v54, %v430_v55 }
 0x237   :  { %v433_v57 = vpop.f32.mrb[6].mxu0 }
 0x238   :  { %v434_v59 = vadd.f32 %v724_v54, %v433_v57  ;;  %v859_v60 = vpop.f32.mrb[7].mxu0 }
 0x23a   :  { %v456_v61 = vpack.c.bf16 %v434_v59, %v431_v58 }
 0x23c   :  { %877 = vmatmul.mubr.bf16.vlgmr.msra.gmra.mrb[4].mxu1 %v456_v61 }
 0x30f   :  { %v545_v8 = vpop.f32.mrb[4].mxu1 }
 0x310   :  { %v546_v9 = vadd.f32 %v734_v7, %v545_v8  ;;  %v878_v10 = vpop.f32.mrb[5].mxu1 }
 0x311   :  { %v548_v11 = vpop.f32.mrb[6].mxu1 }
 0x312   :  { %v743_v12 = vmul.f32 -1.442695, %v546_v9  ;;  %v549_v13 = vadd.f32 %v734_v7, %v548_v11  ;;  %v879_v14 = vpop.f32.mrb[7].mxu1 }
 0x314   :  { %967 = vpow2.f32 %v743_v12  ;;  %v744_v15 = vmul.f32 -1.442695, %v549_v13 }
 0x316   :  { %969 = vpow2.f32 %v744_v15 }
 0x31e   :  { %v968_v16 = vpop.eup %967 }
 0x31f   :  { %v558_v17 = vadd.f32 1.0, %v968_v16 }
 0x320   :  { %v970_v18 = vpop.eup %969 }
 0x321   :  { %971 = vrcp.f32 %v558_v17  ;;  %v559_v0 = vadd.f32 1.0, %v970_v18 }
 0x323   :  { %973 = vrcp.f32 %v559_v0 }
 0x32b   :  { %v972_v19 = vpop.eup %971 }
 0x32c   :  { %v564_v21 = vmul.f32 %v972_v19, %v546_v9 }
 0x32d   :  { %v974_v20 = vpop.eup %973 }
 0x32e   :  { %v565_v22 = vmul.f32 %v974_v20, %v549_v13 }
 0x330   :  { %v585_v23 = vpack.c.bf16 %v565_v22, %v564_v21 }
 0x332   :  { %897 = vmatmul.mubr.bf16.vlgmr.msra.gmra.mrb[0].mxu0 %v585_v23 }
 0x405   :  { %v674_v27 = vpop.f32.mrb[0].mxu0 }
 0x406   :  { %v901_v28 = vadd.f32 %v900_v26, %v674_v27  ;;  %v898_v29 = vpop.f32.mrb[1].mxu0 }
 0x407   :  { %v677_v30 = vpop.f32.mrb[2].mxu0 }
 0x408   :  { %683 = vst [vmem:[#allocation10] sm:$0xff] %v901_v28  ;;  %v903_v31 = vadd.f32 %v900_v26, %v677_v30  ;;  %v899_v32 = vpop.f32.mrb[3].mxu0 }
 0x40a   :  { %684 = vst [vmem:[#allocation10 + $0x8] sm:$0xff] %v903_v31 }
 0x40b   :  { %1074 = shalt.err (!%p1071_p8)
}
 0x40c   :  { %s1075_s0 = scalar_lea.hbm %s1298_s7, 256 }
 0x40d   :  { %p1076_p9 = scmp.ne.s32.totalorder %s1298_s7, %s1075_s0  ;;  %p1079_p10 = scmp.lt.u32.totalorder %s1075_s0, %s1298_s7 }
 0x40f   :  { %p1081_p11 = pnand %p1079_p10, %p1076_p9 }
 0x411   :  { %1084 = shalt.err (!%p1081_p11)
}
 0x412   :  { %696 = dma.vmem_to_hbm [thread:$0]  %s691_s17, 256, %s1298_s7, [#allocation4], %s1097_s1, %s1097_s1, %s1098_s25  }
 0x413   :  { %1091 = dma.done.wait [#allocation4], 256  }
 0x414   :  { %1092 = vsyncadd [#allocation4], 4294967040 }
 0x415   :  { %700 = vsyncpa [#allocation3], 1 }
 0x416   :  { %701 = vsyncpa [#allocation6], 1 }
 0x417   :  { %702 = vsyncpa [#allocation9], 1 }
 0x418   :  { %703 = vsyncpa [#allocation4], 1 }

// kernel: tpu_custom_call.1
= control target key start
LH: loop header
LB: loop body
LE: loop exit
PB: predicated region body
PF: predicated region fallthrough
CT: control target
= control target key end

     0   :  { %12 = vsyncpa [#allocation3], 0  ;;  %s1291_s0 = inlined_call_operand.hbm [shape: f32[16,128], index: 0, kind: input, shape index: {}]   ;;  %s1292_s1 = inlined_call_operand.hbm [shape: bf16[128,128], index: 1, kind: input, shape index: {}]   ;;  %s1293_s2 = inlined_call_operand.vmem [shape: f32[1,128], index: 2, kind: input, shape index: {}]   ;;  %s1294_s3 = inlined_call_operand.hbm [shape: bf16[2,128,128], index: 3, kind: input, shape index: {}]   ;;  %s1295_s4 = inlined_call_operand.vmem [shape: f32[2,1,128], index: 4, kind: input, shape index: {}]   ;;  %s1296_s5 = inlined_call_operand.hbm [shape: bf16[2,128,128], index: 5, kind: input, shape index: {}]   ;;  %s1297_s6 = inlined_call_operand.vmem [shape: f32[2,1,128], index: 6, kind: input, shape index: {}]   ;;  %s1298_s7 = inlined_call_operand.hbm [shape: f32[16,128], index: 7, kind: output, shape index: {}]  }
   0x1   :  { %13 = vsyncpa [#allocation6], 0 }
   0x2   :  { %14 = vsyncpa [#allocation9], 0 }
   0x3   :  { %15 = vsyncpa [#allocation4], 0  ;;  %s1093_s24 = smov [#allocation5]   ;;  %s975_s28 = scalar_lea.hbm %s1292_s1, 1024 }
   0x4   :  { %s33_s25 = sshll.u32 %s1093_s24, 4  ;;  %p976_p0 = scmp.ne.s32.totalorder %s1292_s1, %s975_s28  ;;  %s34_s25 = int_to_ptr.vmem [resolvable:$true] %s33_s25 }
   0x5   :  { %p979_p1 = scmp.lt.u32.totalorder %s975_s28, %s1292_s1 }
   0x7   :  { %p981_p2 = pnand %p979_p1, %p976_p0 }
   0x9   :  { %984 = shalt.err (!%p981_p2)
}
   0xa   :  { %s985_s10 = scalar_lea.vmem %s34_s25, 1024  ;;  %p990_p4 = scmp.lt.s32.totalorder %s34_s25, %s34_s25 }
   0xb   :  { %p986_p3 = scmp.ne.s32.totalorder %s34_s25, %s985_s10  ;;  %p991_p5 = scmp.lt.s32.totalorder %s985_s10, %s985_s10 }
   0xd   :  { %p992_p6 = por %p991_p5, %p990_p4 }
   0xf   :  { %p993_p7 = pnand %p992_p6, %p986_p3 }
  0x11   :  { %996 = shalt.err (!%p993_p7)
}
  0x12   :  { %s1094_s11 = smov 64   ;;  %s1095_s12 = smov 4  }
  0x13   :  { %39 = dma.hbm_to_vmem [thread:$0]  %s1292_s1, 1024, %s34_s25, [#allocation6], %s1094_s11, %s1094_s11, %s1095_s12  }
  0x14   :  { %s1096_s15 = smov [#allocation2]   ;;  %s997_s19 = scalar_lea.hbm %s1291_s0, 256 }
  0x15   :  { %s21_s16 = sshll.u32 %s1096_s15, 4  ;;  %p998_p8 = scmp.ne.s32.totalorder %s1291_s0, %s997_s19  ;;  %s22_s16 = int_to_ptr.vmem [resolvable:$true] %s21_s16 }
  0x16   :  { %p1001_p9 = scmp.lt.u32.totalorder %s997_s19, %s1291_s0 }
  0x18   :  { %p1003_p10 = pnand %p1001_p9, %p998_p8 }
  0x1a   :  { %1006 = shalt.err (!%p1003_p10)
}
  0x1b   :  { %s1007_s24 = scalar_lea.vmem %s22_s16, 256  ;;  %p1012_p12 = scmp.lt.s32.totalorder %s22_s16, %s22_s16 }
  0x1c   :  { %p1008_p11 = scmp.ne.s32.totalorder %s22_s16, %s1007_s24  ;;  %p1013_p13 = scmp.lt.s32.totalorder %s1007_s24, %s1007_s24 }
  0x1e   :  { %p1014_p0 = por %p1013_p13, %p1012_p12 }
  0x20   :  { %p1015_p1 = pnand %p1014_p0, %p1008_p11 }
  0x22   :  { %1018 = shalt.err (!%p1015_p1)
}
  0x23   :  { %s1097_s1 = smov 128   ;;  %s1098_s25 = smov 8  }
  0x24   :  { %27 = dma.hbm_to_vmem [thread:$0]  %s1291_s0, 256, %s22_s16, [#allocation3], %s1097_s1, %s1097_s1, %s1098_s25  }
  0x25   :  { %s1099_s28 = smov [#allocation7]   ;;  %s1100_s30 = smov [#allocation8]  }
  0x26   :  { %s47_s29 = sshll.u32 %s1099_s28, 4  ;;  %s61_s8 = sshll.u32 %s1100_s30, 4  ;;  %s48_s29 = int_to_ptr.vmem [resolvable:$true] %s47_s29  ;;  %s1174_s8 = int_to_ptr.vmem [resolvable:$true] %s61_s8 }
  0x27   :  { %s1019_s13 = scalar_lea.hbm %s1294_s3, 2048 }
  0x28   :  { %p1020_p2 = scmp.ne.s32.totalorder %s1294_s3, %s1019_s13  ;;  %p1023_p3 = scmp.lt.u32.totalorder %s1019_s13, %s1294_s3 }
  0x2a   :  { %p1025_p4 = pnand %p1023_p3, %p1020_p2 }
  0x2c   :  { %1028 = shalt.err (!%p1025_p4)
}
  0x2d   :  { %s1029_s0 = scalar_lea.vmem %s48_s29, 2048  ;;  %p1034_p6 = scmp.lt.s32.totalorder %s48_s29, %s48_s29 }
  0x2e   :  { %p1030_p5 = scmp.ne.s32.totalorder %s48_s29, %s1029_s0  ;;  %p1035_p7 = scmp.lt.s32.totalorder %s1029_s0, %s1029_s0 }
  0x30   :  { %p1036_p8 = por %p1035_p7, %p1034_p6 }
  0x32   :  { %p1037_p9 = pnand %p1036_p8, %p1030_p5 }
  0x34   :  { %1040 = shalt.err (!%p1037_p9)
}
  0x35   :  { %53 = dma.hbm_to_vmem [thread:$0]  %s1294_s3, 2048, %s48_s29, [#allocation6], %s1094_s11, %s1094_s11, %s1095_s12  }
  0x36   :  { %s1041_s22 = scalar_lea.hbm %s1296_s5, 2048 }
  0x37   :  { %p1042_p10 = scmp.ne.s32.totalorder %s1296_s5, %s1041_s22  ;;  %p1045_p11 = scmp.lt.u32.totalorder %s1041_s22, %s1296_s5 }
  0x39   :  { %p1047_p12 = pnand %p1045_p11, %p1042_p10 }
  0x3b   :  { %1050 = shalt.err (!%p1047_p12)
}
  0x3c   :  { %s1051_s28 = scalar_lea.vmem %s1174_s8, 2048  ;;  %p1056_p0 = scmp.lt.s32.totalorder %s1174_s8, %s1174_s8 }
  0x3d   :  { %p1052_p13 = scmp.ne.s32.totalorder %s1174_s8, %s1051_s28  ;;  %p1057_p1 = scmp.lt.s32.totalorder %s1051_s28, %s1051_s28 }
  0x3f   :  { %p1058_p2 = por %p1057_p1, %p1056_p0 }
  0x41   :  { %p1059_p3 = pnand %p1058_p2, %p1052_p13 }
  0x43   :  { %1062 = shalt.err (!%p1059_p3)
}
  0x44   :  { %67 = dma.hbm_to_vmem [thread:$0]  %s1296_s5, 2048, %s1174_s8, [#allocation9], %s1094_s11, %s1094_s11, %s1095_s12  }
  0x45   :  { %1085 = dma.done.wait [#allocation3], 256  }
  0x46   :  { %1086 = vsyncadd [#allocation3], 4294967040 }
  0x47   :  { %1087 = dma.done.wait [#allocation6], 3072  }
  0x48   :  { %1088 = vsyncadd [#allocation6], 4294964224 }
  0x49   :  { %1089 = dma.done.wait [#allocation9], 2048  }
  0x4a   :  { %1090 = vsyncadd [#allocation9], 4294965248  ;;  %v1101_v0 = vmov 0.0   ;;  %vm1102_vm0 = vmmov 0   ;;  %v919_v1 = vld [vmem:[#allocation7] sm:$0xff]   ;;  %v920_v2 = vld [vmem:[#allocation7 + $0x8] sm:$0xff]  }
  0x4b   :  { %820 = vmatprep.subr.bf16.mxu1 %v1101_v0  ;;  %836 = vmatprep.mubr.msk.bf16.mxu1 %vm1102_vm0, %v1101_v0  ;;  %v921_v3 = vld [vmem:[#allocation7 + $0x10] sm:$0xff]   ;;  %v927_v4 = vld [vmem:[#allocation5] sm:$0xff]   ;;  %v922_v5 = vld [vmem:[#allocation7 + $0x18] sm:$0xff]   ;;  %s1103_s15 = smov [#allocation10]  }
  0x4c   :  { %800 = vmatprep.subr.bf16.mxu0 %v1101_v0  ;;  %816 = vmatprep.mubr.msk.bf16.mxu0 %vm1102_vm0, %v1101_v0  ;;  %v928_v6 = vld [vmem:[#allocation5 + $0x8] sm:$0xff]   ;;  %v923_v7 = vld [vmem:[#allocation7 + $0x20] sm:$0xff]   ;;  %v929_v8 = vld [vmem:[#allocation5 + $0x10] sm:$0xff]   ;;  %s690_s17 = sshll.u32 %s1103_s15, 4  ;;  %s691_s17 = int_to_ptr.vmem [resolvable:$true] %s690_s17 }
  0x4d   :  { %821 = vmatpush3.bf16.msra.mxu1 %v919_v1  ;;  %801 = vmatpush3.bf16.msra.mxu0 %v927_v4  ;;  %v924_v9 = vld [vmem:[#allocation7 + $0x28] sm:$0xff]   ;;  %v930_v10 = vld [vmem:[#allocation5 + $0x18] sm:$0xff]   ;;  %v925_v11 = vld [vmem:[#allocation7 + $0x30] sm:$0xff]   ;;  %s1063_s18 = scalar_lea.vmem %s691_s17, 256  ;;  %p1068_p5 = scmp.lt.s32.totalorder %s691_s17, %s691_s17 }
  0x4e   :  { %822 = vmatprep.subr.bf16.mxu1 %v1101_v0  ;;  %802 = vmatprep.subr.bf16.mxu0 %v1101_v0  ;;  %v931_v12 = vld [vmem:[#allocation5 + $0x20] sm:$0xff]   ;;  %v926_v13 = vld [vmem:[#allocation7 + $0x38] sm:$0xff]   ;;  %v83_v14 = vld [vmem:[#allocation2] sm:$0xff]  ;;  %p1064_p4 = scmp.ne.s32.totalorder %s691_s17, %s1063_s18  ;;  %p1069_p6 = scmp.lt.s32.totalorder %s1063_s18, %s1063_s18 }
  0x4f   :  { %v84_v15 = vld [vmem:[#allocation2 + $0x8] sm:$0xff]  ;;  %v932_v16 = vld [vmem:[#allocation5 + $0x28] sm:$0xff]   ;;  %v933_v18 = vld [vmem:[#allocation5 + $0x30] sm:$0xff]  }
  0x50   :  { %v102_v17 = vpack.c.bf16 %v84_v15, %v83_v14  ;;  %v934_v19 = vld [vmem:[#allocation5 + $0x38] sm:$0xff]   ;;  %v935_v20 = vld [vmem:[#allocation8] sm:$0xff]   ;;  %v936_v21 = vld [vmem:[#allocation8 + $0x8] sm:$0xff]   ;;  %p1070_p7 = por %p1069_p6, %p1068_p5 }
  0x51   :  { %823 = vmatpush3.bf16.msra.mxu1 %v920_v2  ;;  %803 = vmatpush3.bf16.msra.mxu0 %v928_v6  ;;  %v937_v22 = vld [vmem:[#allocation8 + $0x10] sm:$0xff]   ;;  %v938_v23 = vld [vmem:[#allocation8 + $0x18] sm:$0xff]   ;;  %v939_v24 = vld [vmem:[#allocation8 + $0x20] sm:$0xff]  }
  0x52   :  { %824 = vmatprep.subr.bf16.mxu1 %v1101_v0  ;;  %804 = vmatprep.subr.bf16.mxu0 %v1101_v0  ;;  %v940_v25 = vld [vmem:[#allocation8 + $0x28] sm:$0xff]   ;;  %v941_v26 = vld [vmem:[#allocation8 + $0x30] sm:$0xff]   ;;  %v942_v27 = vld [vmem:[#allocation8 + $0x38] sm:$0xff]   ;;  %p1071_p8 = pnand %p1070_p7, %p1064_p4 }
  0x53   :  { %v943_v28 = vld [vmem:[#allocation7 + $0x40] sm:$0xff]   ;;  %v944_v29 = vld [vmem:[#allocation7 + $0x48] sm:$0xff]   ;;  %v945_v30 = vld [vmem:[#allocation7 + $0x50] sm:$0xff]  }
  0x54   :  { %v946_v31 = vld [vmem:[#allocation7 + $0x58] sm:$0xff]   ;;  %v947_v32 = vld [vmem:[#allocation7 + $0x60] sm:$0xff]   ;;  %v948_v33 = vld [vmem:[#allocation7 + $0x68] sm:$0xff]  }
  0x55   :  { %825 = vmatpush3.bf16.msra.mxu1 %v921_v3  ;;  %805 = vmatpush3.bf16.msra.mxu0 %v929_v8  ;;  %v713_v34 = vld [vmem:[%s1295_s4] ss:$0 sm:$0xff]  ;;  %v950_v53 = vld [vmem:[#allocation7 + $0x78] sm:$0xff]   ;;  %v951_v62 = vld [vmem:[#allocation8 + $0x40] sm:$0xff]  }
  0x56   :  { %826 = vmatprep.subr.bf16.mxu1 %v1101_v0  ;;  %806 = vmatprep.subr.bf16.mxu0 %v1101_v0  ;;  %v949_v52 = vld [vmem:[#allocation7 + $0x70] sm:$0xff]   ;;  %v952_v63 = vld [vmem:[#allocation8 + $0x48] sm:$0xff]   ;;  %v954_v2 = vld [vmem:[#allocation8 + $0x58] sm:$0xff]  }
  0x57   :  { %v724_v54 = vld [vmem:[%s1297_s6] ss:$0 sm:$0xff]  ;;  %v955_v3 = vld [vmem:[#allocation8 + $0x60] sm:$0xff]   ;;  %v956_v4 = vld [vmem:[#allocation8 + $0x68] sm:$0xff]  }
  0x58   :  { %v953_v1 = vld [vmem:[#allocation8 + $0x50] sm:$0xff]   ;;  %v958_v6 = vld [vmem:[#allocation8 + $0x78] sm:$0xff]  }
  0x59   :  { %827 = vmatpush3.bf16.msra.mxu1 %v922_v5  ;;  %807 = vmatpush3.bf16.msra.mxu0 %v930_v10  ;;  %v957_v5 = vld [vmem:[#allocation8 + $0x70] sm:$0xff]  }
  0x5a   :  { %828 = vmatprep.subr.bf16.mxu1 %v1101_v0  ;;  %808 = vmatprep.subr.bf16.mxu0 %v1101_v0 }
  0x5d   :  { %829 = vmatpush3.bf16.msra.mxu1 %v923_v7  ;;  %809 = vmatpush3.bf16.msra.mxu0 %v931_v12  ;;  %v734_v7 = vld [vmem:[%s1295_s4 + $0x1] ss:$0 sm:$0xff] }
  0x5e   :  { %830 = vmatprep.subr.bf16.mxu1 %v1101_v0  ;;  %810 = vmatprep.subr.bf16.mxu0 %v1101_v0 }
  0x61   :  { %831 = vmatpush3.bf16.msra.mxu1 %v924_v9  ;;  %811 = vmatpush3.bf16.msra.mxu0 %v932_v16 }
  0x62   :  { %832 = vmatprep.subr.bf16.mxu1 %v1101_v0  ;;  %812 = vmatprep.subr.bf16.mxu0 %v1101_v0 }
  0x65   :  { %833 = vmatpush3.bf16.msra.mxu1 %v925_v11  ;;  %813 = vmatpush3.bf16.msra.mxu0 %v933_v18 }
  0x66   :  { %834 = vmatprep.subr.bf16.mxu1 %v1101_v0  ;;  %814 = vmatprep.subr.bf16.mxu0 %v1101_v0 }
  0x69   :  { %835 = vmatpush3.bf16.msra.mxu1 %v926_v13  ;;  %815 = vmatpush3.bf16.msra.mxu0 %v934_v19 }
  0x6a   :  { %860 = vmatprep.subr.bf16.mxu1 %v1101_v0  ;;  %840 = vmatprep.subr.bf16.mxu0 %v1101_v0 }
  0x6c   :  { %837 = vmatmul.mubr.bf16.vlgmr.msra.gmra.mrb[0].mxu1 %v102_v17  ;;  %817 = vmatmul.mubr.bf16.vlgmr.msra.gmra.mrb[0].mxu0 %v102_v17 }
  0x6d   :  { %876 = vmatprep.mubr.msk.bf16.mxu1 %vm1102_vm0, %v1101_v0  ;;  %856 = vmatprep.mubr.msk.bf16.mxu0 %vm1102_vm0, %v1101_v0 }
  0x6e   :  { %841 = vmatpush3.bf16.msra.mxu0 %v935_v20  ;;  %861 = vmatpush3.bf16.msra.mxu1 %v943_v28 }
  0x6f   :  { %842 = vmatprep.subr.bf16.mxu0 %v1101_v0  ;;  %862 = vmatprep.subr.bf16.mxu1 %v1101_v0 }
  0x72   :  { %843 = vmatpush3.bf16.msra.mxu0 %v936_v21  ;;  %863 = vmatpush3.bf16.msra.mxu1 %v944_v29 }
  0x73   :  { %844 = vmatprep.subr.bf16.mxu0 %v1101_v0  ;;  %864 = vmatprep.subr.bf16.mxu1 %v1101_v0 }
  0x76   :  { %845 = vmatpush3.bf16.msra.mxu0 %v937_v22  ;;  %865 = vmatpush3.bf16.msra.mxu1 %v945_v30 }
  0x77   :  { %846 = vmatprep.subr.bf16.mxu0 %v1101_v0  ;;  %866 = vmatprep.subr.bf16.mxu1 %v1101_v0 }
  0x7a   :  { %847 = vmatpush3.bf16.msra.mxu0 %v938_v23  ;;  %867 = vmatpush3.bf16.msra.mxu1 %v946_v31 }
  0x7b   :  { %848 = vmatprep.subr.bf16.mxu0 %v1101_v0  ;;  %868 = vmatprep.subr.bf16.mxu1 %v1101_v0 }
  0x7e   :  { %849 = vmatpush3.bf16.msra.mxu0 %v939_v24  ;;  %869 = vmatpush3.bf16.msra.mxu1 %v947_v32  ;;  %v704_v24 = vld [vmem:[%s1293_s2] ss:$0 sm:$0xff] }
  0x7f   :  { %850 = vmatprep.subr.bf16.mxu0 %v1101_v0  ;;  %870 = vmatprep.subr.bf16.mxu1 %v1101_v0 }
  0x82   :  { %851 = vmatpush3.bf16.msra.mxu0 %v940_v25  ;;  %871 = vmatpush3.bf16.msra.mxu1 %v948_v33  ;;  %v746_v25 = vld [vmem:[%s1297_s6 + $0x1] ss:$0 sm:$0xff] }
  0x83   :  { %852 = vmatprep.subr.bf16.mxu0 %v1101_v0  ;;  %872 = vmatprep.subr.bf16.mxu1 %v1101_v0 }
  0x86   :  { %853 = vmatpush3.bf16.msra.mxu0 %v941_v26  ;;  %873 = vmatpush3.bf16.msra.mxu1 %v949_v52  ;;  %v900_v26 = vadd.f32 %v746_v25, %v704_v24 }
  0x87   :  { %854 = vmatprep.subr.bf16.mxu0 %v1101_v0  ;;  %874 = vmatprep.subr.bf16.mxu1 %v1101_v0 }
  0x8a   :  { %855 = vmatpush3.bf16.msra.mxu0 %v942_v27  ;;  %875 = vmatpush3.bf16.msra.mxu1 %v950_v53 }
  0x8b   :  { %880 = vmatprep.subr.bf16.mxu0 %v1101_v0 }
 0x13f   :  { %v303_v35 = vpop.f32.mrb[0].mxu1 }
 0x140   :  { %v304_v36 = vadd.f32 %v713_v34, %v303_v35  ;;  %v838_v37 = vpop.f32.mrb[1].mxu1 }
 0x141   :  { %v306_v38 = vpop.f32.mrb[2].mxu1 }
 0x142   :  { %v722_v39 = vmul.f32 -1.442695, %v304_v36  ;;  %v307_v40 = vadd.f32 %v713_v34, %v306_v38  ;;  %v839_v41 = vpop.f32.mrb[3].mxu1 }
 0x144   :  { %959 = vpow2.f32 %v722_v39  ;;  %v723_v42 = vmul.f32 -1.442695, %v307_v40 }
 0x146   :  { %961 = vpow2.f32 %v723_v42 }
 0x14e   :  { %v960_v43 = vpop.eup %959 }
 0x14f   :  { %v316_v44 = vadd.f32 1.0, %v960_v43 }
 0x150   :  { %v962_v45 = vpop.eup %961 }
 0x151   :  { %963 = vrcp.f32 %v316_v44  ;;  %v317_v46 = vadd.f32 1.0, %v962_v45 }
 0x153   :  { %965 = vrcp.f32 %v317_v46 }
 0x15b   :  { %v964_v47 = vpop.eup %963 }
 0x15c   :  { %v322_v49 = vmul.f32 %v964_v47, %v304_v36 }
 0x15d   :  { %v966_v48 = vpop.eup %965 }
 0x15e   :  { %v323_v50 = vmul.f32 %v966_v48, %v307_v40 }
 0x160   :  { %v341_v51 = vpack.c.bf16 %v323_v50, %v322_v49 }
 0x162   :  { %857 = vmatmul.mubr.bf16.vlgmr.msra.gmra.mrb[4].mxu0 %v341_v51 }
 0x163   :  { %896 = vmatprep.mubr.msk.bf16.mxu0 %vm1102_vm0, %v1101_v0  ;;  %881 = vmatpush3.bf16.msra.mxu0 %v951_v62 }
 0x164   :  { %882 = vmatprep.subr.bf16.mxu0 %v1101_v0 }
 0x167   :  { %883 = vmatpush3.bf16.msra.mxu0 %v952_v63 }
 0x168   :  { %884 = vmatprep.subr.bf16.mxu0 %v1101_v0 }
 0x16b   :  { %885 = vmatpush3.bf16.msra.mxu0 %v953_v1 }
 0x16c   :  { %886 = vmatprep.subr.bf16.mxu0 %v1101_v0 }
 0x16f   :  { %887 = vmatpush3.bf16.msra.mxu0 %v954_v2 }
 0x170   :  { %888 = vmatprep.subr.bf16.mxu0 %v1101_v0 }
 0x173   :  { %889 = vmatpush3.bf16.msra.mxu0 %v955_v3 }
 0x174   :  { %890 = vmatprep.subr.bf16.mxu0 %v1101_v0 }
 0x177   :  { %891 = vmatpush3.bf16.msra.mxu0 %v956_v4 }
 0x178   :  { %892 = vmatprep.subr.bf16.mxu0 %v1101_v0 }
 0x17b   :  { %893 = vmatpush3.bf16.msra.mxu0 %v957_v5 }
 0x17c   :  { %894 = vmatprep.subr.bf16.mxu0 %v1101_v0 }
 0x17f   :  { %895 = vmatpush3.bf16.msra.mxu0 %v958_v6 }
 0x235   :  { %v430_v55 = vpop.f32.mrb[4].mxu0 }
 0x236   :  { %v858_v56 = vpop.f32.mrb[5].mxu0  ;;  %v431_v58 = vadd.f32 %v724_v54, %v430_v55 }
 0x237   :  { %v433_v57 = vpop.f32.mrb[6].mxu0 }
 0x238   :  { %v434_v59 = vadd.f32 %v724_v54, %v433_v57  ;;  %v859_v60 = vpop.f32.mrb[7].mxu0 }
 0x23a   :  { %v456_v61 = vpack.c.bf16 %v434_v59, %v431_v58 }
 0x23c   :  { %877 = vmatmul.mubr.bf16.vlgmr.msra.gmra.mrb[4].mxu1 %v456_v61 }
 0x30f   :  { %v545_v8 = vpop.f32.mrb[4].mxu1 }
 0x310   :  { %v546_v9 = vadd.f32 %v734_v7, %v545_v8  ;;  %v878_v10 = vpop.f32.mrb[5].mxu1 }
 0x311   :  { %v548_v11 = vpop.f32.mrb[6].mxu1 }
 0x312   :  { %v743_v12 = vmul.f32 -1.442695, %v546_v9  ;;  %v549_v13 = vadd.f32 %v734_v7, %v548_v11  ;;  %v879_v14 = vpop.f32.mrb[7].mxu1 }
 0x314   :  { %967 = vpow2.f32 %v743_v12  ;;  %v744_v15 = vmul.f32 -1.442695, %v549_v13 }
 0x316   :  { %969 = vpow2.f32 %v744_v15 }
 0x31e   :  { %v968_v16 = vpop.eup %967 }
 0x31f   :  { %v558_v17 = vadd.f32 1.0, %v968_v16 }
 0x320   :  { %v970_v18 = vpop.eup %969 }
 0x321   :  { %971 = vrcp.f32 %v558_v17  ;;  %v559_v0 = vadd.f32 1.0, %v970_v18 }
 0x323   :  { %973 = vrcp.f32 %v559_v0 }
 0x32b   :  { %v972_v19 = vpop.eup %971 }
 0x32c   :  { %v564_v21 = vmul.f32 %v972_v19, %v546_v9 }
 0x32d   :  { %v974_v20 = vpop.eup %973 }
 0x32e   :  { %v565_v22 = vmul.f32 %v974_v20, %v549_v13 }
 0x330   :  { %v585_v23 = vpack.c.bf16 %v565_v22, %v564_v21 }
 0x332   :  { %897 = vmatmul.mubr.bf16.vlgmr.msra.gmra.mrb[0].mxu0 %v585_v23 }
 0x405   :  { %v674_v27 = vpop.f32.mrb[0].mxu0 }
 0x406   :  { %v901_v28 = vadd.f32 %v900_v26, %v674_v27  ;;  %v898_v29 = vpop.f32.mrb[1].mxu0 }
 0x407   :  { %v677_v30 = vpop.f32.mrb[2].mxu0 }
 0x408   :  { %683 = vst [vmem:[#allocation10] sm:$0xff] %v901_v28  ;;  %v903_v31 = vadd.f32 %v900_v26, %v677_v30  ;;  %v899_v32 = vpop.f32.mrb[3].mxu0 }
 0x40a   :  { %684 = vst [vmem:[#allocation10 + $0x8] sm:$0xff] %v903_v31 }
 0x40b   :  { %1074 = shalt.err (!%p1071_p8)
}
 0x40c   :  { %s1075_s0 = scalar_lea.hbm %s1298_s7, 256 }
 0x40d   :  { %p1076_p9 = scmp.ne.s32.totalorder %s1298_s7, %s1075_s0  ;;  %p1079_p10 = scmp.lt.u32.totalorder %s1075_s0, %s1298_s7 }
 0x40f   :  { %p1081_p11 = pnand %p1079_p10, %p1076_p9 }
 0x411   :  { %1084 = shalt.err (!%p1081_p11)
}
 0x412   :  { %696 = dma.vmem_to_hbm [thread:$0]  %s691_s17, 256, %s1298_s7, [#allocation4], %s1097_s1, %s1097_s1, %s1098_s25  }
 0x413   :  { %1091 = dma.done.wait [#allocation4], 256  }
 0x414   :  { %1092 = vsyncadd [#allocation4], 4294967040 }
 0x415   :  { %700 = vsyncpa [#allocation3], 1 }
 0x416   :  { %701 = vsyncpa [#allocation6], 1 }
 0x417   :  { %702 = vsyncpa [#allocation9], 1 }
 0x418   :  { %703 = vsyncpa [#allocation4], 1 }

</bundles_post_ra>
